<compile_context>
chip_gen: v6e
topology: v6e:2x2x1
jax: 0.10.0
libtpu: 0.0.40
codegen_flags: <defaults>
</compile_context>

<pallas_src>
import functools

import jax
import jax.numpy as jnp
from jax import lax
from jax.experimental import pallas as pl
from jax.experimental.pallas import tpu as pltpu


def _round_up(n, m):
    return ((n + m - 1) // m) * m


def _sekt_lstm_kernel(xw_ref, whh_ref, wout_ref, bout_ref, y_ref,
                      hs_scr, h_scr, c_scr, *, hidden):
    """One T-chunk of the SEKT 'q' forward (input projection already folded).

    Shapes (G = round_up(4*H, 128), gate g lives in cols [g*H, (g+1)*H)):
      xw_ref   : (Tc, Bp, G)   x @ W_ih^T + (b_ih + b_hh), time-major
      whh_ref  : (G, G)        W_hh^T, rows [H:G) zero
      wout_ref : (G, NQp)      W_out^T, rows [H:G) zero
      bout_ref : (1, NQp)
      y_ref    : (Tc, Bp, NQp) sigmoid(out_layer(h))
    Scratch:
      hs_scr (Tc, Bp, G), h_scr (Bp, G), c_scr (Bp, H) — h/c carry across chunks.
    """
    Tc, Bp, G = xw_ref.shape
    H = hidden
    NQp = y_ref.shape[-1]

    # Initialize the carried LSTM state on the first chunk only.  Lanes [H:G)
    # of h_scr are zeroed here and never written again, so the K=G recurrent
    # matmul (whose rows [H:G) are also zero) stays exact.
    @pl.when(pl.program_id(0) == 0)
    def _():
        h_scr[...] = jnp.zeros_like(h_scr)
        c_scr[...] = jnp.zeros_like(c_scr)

    def step(t, carry):
        # Serial critical path: one (Bp,G)@(G,G) matmul + elementwise gates.
        gates = xw_ref[t] + jnp.dot(h_scr[...], whh_ref[...],
                                    preferred_element_type=jnp.float32)
        # Evaluate both nonlinearities once on the full 128-lane vreg, then
        # pick tanh only on the cell-gate lanes (PyTorch order i, f, g, o).
        sig = jax.nn.sigmoid(gates)
        th = jnp.tanh(gates)
        lane = lax.broadcasted_iota(jnp.int32, gates.shape, 1)
        act = jnp.where((lane >= 2 * H) & (lane < 3 * H), th, sig)

        i_g = act[:, 0 * H:1 * H]
        f_g = act[:, 1 * H:2 * H]
        g_g = act[:, 2 * H:3 * H]
        o_g = act[:, 3 * H:4 * H]

        c_new = f_g * c_scr[...] + i_g * g_g
        h_new = o_g * jnp.tanh(c_new)

        c_scr[...] = c_new
        h_scr[:, 0:H] = h_new          # lanes [H:G) remain exactly 0
        hs_scr[t] = h_scr[...]         # full-width store for the deferred proj
        return carry

    lax.fori_loop(0, Tc, step, 0, unroll=True)

    # Deferred output projection + sigmoid: one lane-dense batched matmul and a
    # single dense (Tc, Bp, NQp) output store per chunk.
    h_all = hs_scr[...].reshape(Tc * Bp, G)
    logits = jnp.dot(h_all, wout_ref[...],
                     preferred_element_type=jnp.float32) + bout_ref[...]
    y_ref[...] = jax.nn.sigmoid(logits).reshape(Tc, Bp, NQp).astype(y_ref.dtype)


def prepare_sekt_params(params):
    """One-time parameter preparation (call once, reuse every forward)."""
    num_q = params["num_q"]
    H = params["hidden_size"]
    G = _round_up(4 * H, 128)
    NQp = _round_up(num_q, 128)

    w_ih = params["w_ih"].astype(jnp.float32)                    # (4H, E)
    w_hh = params["w_hh"].astype(jnp.float32)                    # (4H, H)
    b = (params["b_ih"] + params["b_hh"]).astype(jnp.float32)    # (4H,)
    emb_q = params["emb_q"].astype(jnp.float32)                  # (2*num_q, E)

    # Fold Embedding -> W_ih projection -> bias into a single gather table:
    # per-step input contribution becomes a row lookup, no kernel matmul.
    proj = emb_q @ w_ih.T + b                                    # (2*num_q, 4H)
    proj_table = jnp.pad(proj, ((0, 0), (0, G - 4 * H)))

    whh_p = jnp.pad(w_hh.T, ((0, G - H), (0, G - 4 * H)))        # (G, G)
    wout_p = jnp.pad(params["w_out"].T.astype(jnp.float32),
                     ((0, G - H), (0, NQp - num_q)))             # (G, NQp)
    bout_p = jnp.pad(params["b_out"].astype(jnp.float32),
                     (0, NQp - num_q)).reshape(1, NQp)           # (1, NQp)

    return {"proj_table": proj_table, "whh_p": whh_p,
            "wout_p": wout_p, "bout_p": bout_p}


@functools.partial(jax.jit, static_argnames=("num_q", "hidden_size", "t_chunk"))
def sekt_forward_q(q, r, proj_table, whh_p, wout_p, bout_p, *,
                   num_q, hidden_size, t_chunk=None):
    """SEKT.forward(q, r, 'q') — returns (B, T, num_q) float32 probabilities."""
    H = hidden_size
    B, T = q.shape
    G = proj_table.shape[1]
    NQp = wout_p.shape[1]
    Bp = _round_up(B, 8)
    Tc = T if t_chunk is None else t_chunk
    assert T % Tc == 0, "t_chunk must divide T"
    num_chunks = T // Tc

    # Per-call glue: gather the folded input-projection rows, go time-major,
    # pad the batch to a sublane multiple.  (Fused under this jit.)
    x_idx = q + num_q * r                                        # (B, T)
    xw = jnp.take(proj_table, x_idx, axis=0)                     # (B, T, G)
    xw = jnp.transpose(xw, (1, 0, 2))                            # (T, B, G)
    xw = jnp.pad(xw, ((0, 0), (0, Bp - B), (0, 0)))              # (T, Bp, G)

    y_pad = pl.pallas_call(
        functools.partial(_sekt_lstm_kernel, hidden=H),
        out_shape=jax.ShapeDtypeStruct((T, Bp, NQp), jnp.float32),
        grid=(num_chunks,),
        in_specs=[
            pl.BlockSpec((Tc, Bp, G), lambda i: (i, 0, 0)),      # xw chunk
            pl.BlockSpec((G, G), lambda i: (0, 0)),              # W_hh^T
            pl.BlockSpec((G, NQp), lambda i: (0, 0)),            # W_out^T
            pl.BlockSpec((1, NQp), lambda i: (0, 0)),            # b_out
        ],
        out_specs=pl.BlockSpec((Tc, Bp, NQp), lambda i: (i, 0, 0)),
        scratch_shapes=[
            pltpu.VMEM((Tc, Bp, G), jnp.float32),   # h sequence (chunk-local)
            pltpu.VMEM((Bp, G), jnp.float32),       # h state (carried)
            pltpu.VMEM((Bp, H), jnp.float32),       # c state (carried)
        ],
        compiler_params=pltpu.CompilerParams(
            dimension_semantics=("arbitrary",)),    # chunks are sequential
    )(xw, whh_p, wout_p, bout_p)

    # strip padding, back to PyTorch batch_first convention
    return jnp.transpose(y_pad[:, :B, :num_q], (1, 0, 2))        # (B, T, num_q)


def sekt_forward_q_ref(q, r, params):
    """Pure-JAX reference (lax.scan LSTM) for correctness checking."""
    num_q = params["num_q"]
    H = params["hidden_size"]
    x_idx = q + num_q * r
    emb = jnp.take(params["emb_q"], x_idx, axis=0)        # (B, T, E)
    x_tbe = jnp.transpose(emb, (1, 0, 2)).astype(jnp.float32)

    wih_t = params["w_ih"].T
    whh_t = params["w_hh"].T
    b = params["b_ih"] + params["b_hh"]

    def step(carry, x_t):
        h, c = carry
        gates = x_t @ wih_t + h @ whh_t + b
        i_g = jax.nn.sigmoid(gates[:, 0:H])
        f_g = jax.nn.sigmoid(gates[:, H:2 * H])
        g_g = jnp.tanh(gates[:, 2 * H:3 * H])
        o_g = jax.nn.sigmoid(gates[:, 3 * H:4 * H])
        c_new = f_g * c + i_g * g_g
        h_new = o_g * jnp.tanh(c_new)
        return (h_new, c_new), h_new

    B = q.shape[0]
    h0 = jnp.zeros((B, H), jnp.float32)
    c0 = jnp.zeros((B, H), jnp.float32)
    _, h_seq = lax.scan(step, (h0, c0), x_tbe)            # (T, B, H)
    y = jax.nn.sigmoid(h_seq @ params["w_out"].T + params["b_out"])
    return jnp.transpose(y, (1, 0, 2))


def make_params(key, num_q, emb_sizeq, hidden_size):
    ks = jax.random.split(key, 7)
    scale = 0.1
    return {
        "num_q": num_q,
        "hidden_size": hidden_size,
        "emb_q": scale * jax.random.normal(ks[0], (num_q * 2, emb_sizeq), jnp.float32),
        "w_ih": scale * jax.random.normal(ks[1], (4 * hidden_size, emb_sizeq), jnp.float32),
        "w_hh": scale * jax.random.normal(ks[2], (4 * hidden_size, hidden_size), jnp.float32),
        "b_ih": scale * jax.random.normal(ks[3], (4 * hidden_size,), jnp.float32),
        "b_hh": scale * jax.random.normal(ks[4], (4 * hidden_size,), jnp.float32),
        "w_out": scale * jax.random.normal(ks[5], (num_q, hidden_size), jnp.float32),
        "b_out": scale * jax.random.normal(ks[6], (num_q,), jnp.float32),
    }


if __name__ == "__main__":
    # small shapes consistent with the module's forward
    num_q, num_s = 16, 10          # num_s unused on the 'q' path
    emb_sizeq, hidden_size = 32, 32
    B, T = 2, 8

    key = jax.random.PRNGKey(0)
    kp, kq, kr = jax.random.split(key, 3)
    params = make_params(kp, num_q, emb_sizeq, hidden_size)
    prep = prepare_sekt_params(params)     # one-time weight prep (reused per call)

    q = jax.random.randint(kq, (B, T), 0, num_q, dtype=jnp.int32)
    r = jax.random.randint(kr, (B, T), 0, 2, dtype=jnp.int32)

    y = sekt_forward_q(q, r, prep["proj_table"], prep["whh_p"],
                       prep["wout_p"], prep["bout_p"],
                       num_q=num_q, hidden_size=hidden_size, t_chunk=4)
    y = jax.block_until_ready(y)

    y_ref = jax.block_until_ready(sekt_forward_q_ref(q, r, params))
    assert y.shape == (B, T, num_q)
    assert jnp.allclose(y, y_ref, rtol=1e-4, atol=1e-4), "mismatch vs reference"

    print("KERNEL_OK")
</pallas_src>

<mosaic_0001>
module attributes {stable_mosaic.version = 11 : i64} {
  func.func @_sekt_lstm_kernel(%arg0: i32, %arg1: memref<4x8x128xf32, #tpu.memory_space<vmem>>, %arg2: memref<128x128xf32, #tpu.memory_space<vmem>>, %arg3: memref<128x128xf32, #tpu.memory_space<vmem>>, %arg4: memref<1x128xf32, #tpu.memory_space<vmem>>, %arg5: memref<4x8x128xf32, #tpu.memory_space<vmem>>, %arg6: memref<4x8x128xf32, #tpu.memory_space<vmem>>, %arg7: memref<8x128xf32, #tpu.memory_space<vmem>>, %arg8: memref<8x32xf32, #tpu.memory_space<vmem>>) attributes {dimension_semantics = [#tpu.dimension_semantics<arbitrary>], iteration_bounds = array<i64: 2>, scalar_prefetch = 0 : i64, scratch_operands = 3 : i64, tpu.core_type = #tpu.core_type<tc>, window_params = [{transform_indices = @transform_0, window_bounds = array<i64: 4, 8, 128>}, {pipeline_mode = #tpu.pipeline_mode<synchronous>, transform_indices = @transform_1, window_bounds = array<i64: 128, 128>}, {pipeline_mode = #tpu.pipeline_mode<synchronous>, transform_indices = @transform_2, window_bounds = array<i64: 128, 128>}, {pipeline_mode = #tpu.pipeline_mode<synchronous>, transform_indices = @transform_3, window_bounds = array<i64: 1, 128>}, {transform_indices = @transform_4, window_bounds = array<i64: 4, 8, 128>}]} {
    %c0_i32 = arith.constant 0 : i32
    %0 = arith.cmpi eq, %arg0, %c0_i32 : i32
    %1 = arith.extui %0 : i1 to i32
    %c0_i32_0 = arith.constant 0 : i32
    %2 = arith.cmpi ne, %1, %c0_i32_0 : i32
    scf.if %2 {
      %cst_90 = arith.constant 0.000000e+00 : f32
      %165 = vector.broadcast %cst_90 : f32 to vector<8x128xf32>
      %c0_91 = arith.constant 0 : index
      %c0_92 = arith.constant 0 : index
      %166 = vector.load %arg7[%c0_91, %c0_92] : memref<8x128xf32, #tpu.memory_space<vmem>>, vector<8x128xf32>
      tpu.vector_store %arg7[%c0_91, %c0_92], %165 {strides = array<i32>} : memref<8x128xf32, #tpu.memory_space<vmem>>, vector<8x128xf32>,
      %cst_93 = arith.constant 0.000000e+00 : f32
      %167 = vector.broadcast %cst_93 : f32 to vector<8x32xf32>
      %c0_94 = arith.constant 0 : index
      %c0_95 = arith.constant 0 : index
      %168 = vector.load %arg8[%c0_94, %c0_95] : memref<8x32xf32, #tpu.memory_space<vmem>>, vector<8x32xf32>
      tpu.vector_store %arg8[%c0_94, %c0_95], %167 {strides = array<i32>} : memref<8x32xf32, #tpu.memory_space<vmem>>, vector<8x32xf32>,
    } else {
    }
    %c0_i32_1 = arith.constant 0 : i32
    %3 = arith.index_cast %c0_i32_1 : i32 to index
    %c0 = arith.constant 0 : index
    %c0_2 = arith.constant 0 : index
    %4 = vector.load %arg1[%3, %c0, %c0_2] : memref<4x8x128xf32, #tpu.memory_space<vmem>>, vector<1x8x128xf32>
    %5 = vector.shape_cast %4 : vector<1x8x128xf32> to vector<8x128xf32>
    %c0_3 = arith.constant 0 : index
    %c0_4 = arith.constant 0 : index
    %6 = vector.load %arg7[%c0_3, %c0_4] : memref<8x128xf32, #tpu.memory_space<vmem>>, vector<8x128xf32>
    %c0_5 = arith.constant 0 : index
    %c0_6 = arith.constant 0 : index
    %7 = vector.load %arg2[%c0_5, %c0_6] : memref<128x128xf32, #tpu.memory_space<vmem>>, vector<128x128xf32>
    %cst = arith.constant dense<0.000000e+00> : vector<8x128xf32>
    %8 = tpu.matmul %6, %7, %cst {dimension_numbers = #tpu.dot_dimension_numbers<[1], [0], [0], [1], [0, 0, 1, 1], [], []>} : vector<8x128xf32>, vector<128x128xf32>, vector<8x128xf32> -> vector<8x128xf32>
    %9 = arith.addf %5, %8 : vector<8x128xf32>
    %10 = arith.negf %9 : vector<8x128xf32>
    %11 = math.exp %10 : vector<8x128xf32>
    %cst_7 = arith.constant 1.000000e+00 : f32
    %12 = vector.broadcast %cst_7 : f32 to vector<8x128xf32>
    %13 = arith.addf %12, %11 : vector<8x128xf32>
    %14 = arith.divf %12, %13 : vector<8x128xf32>
    %15 = math.tanh %9 : vector<8x128xf32>
    %16 = tpu.iota {dimensions = array<i32: 1>} : vector<8x128xi32>
    %c64_i32 = arith.constant 64 : i32
    %17 = vector.broadcast %c64_i32 : i32 to vector<8x128xi32>
    %18 = arith.cmpi sge, %16, %17 : vector<8x128xi32>
    %c96_i32 = arith.constant 96 : i32
    %19 = vector.broadcast %c96_i32 : i32 to vector<8x128xi32>
    %20 = arith.cmpi slt, %16, %19 : vector<8x128xi32>
    %21 = arith.andi %18, %20 : vector<8x128xi1>
    %22 = arith.select %21, %15, %14 : vector<8x128xi1>, vector<8x128xf32>
    %23 = vector.extract_strided_slice %22 {offsets = [0, 0], sizes = [8, 32], strides = [1, 1]} : vector<8x128xf32> to vector<8x32xf32>
    %24 = vector.extract_strided_slice %22 {offsets = [0, 32], sizes = [8, 32], strides = [1, 1]} : vector<8x128xf32> to vector<8x32xf32>
    %25 = vector.extract_strided_slice %22 {offsets = [0, 64], sizes = [8, 32], strides = [1, 1]} : vector<8x128xf32> to vector<8x32xf32>
    %26 = vector.extract_strided_slice %22 {offsets = [0, 96], sizes = [8, 32], strides = [1, 1]} : vector<8x128xf32> to vector<8x32xf32>
    %c0_8 = arith.constant 0 : index
    %c0_9 = arith.constant 0 : index
    %27 = vector.load %arg8[%c0_8, %c0_9] : memref<8x32xf32, #tpu.memory_space<vmem>>, vector<8x32xf32>
    %28 = arith.mulf %24, %27 : vector<8x32xf32>
    %29 = arith.mulf %23, %25 : vector<8x32xf32>
    %30 = arith.addf %28, %29 : vector<8x32xf32>
    %31 = math.tanh %30 : vector<8x32xf32>
    %32 = arith.mulf %26, %31 : vector<8x32xf32>
    %c0_10 = arith.constant 0 : index
    %c0_11 = arith.constant 0 : index
    %33 = vector.load %arg8[%c0_10, %c0_11] : memref<8x32xf32, #tpu.memory_space<vmem>>, vector<8x32xf32>
    tpu.vector_store %arg8[%c0_10, %c0_11], %30 {strides = array<i32>} : memref<8x32xf32, #tpu.memory_space<vmem>>, vector<8x32xf32>,
    %c0_12 = arith.constant 0 : index
    %c0_13 = arith.constant 0 : index
    %34 = vector.load %arg7[%c0_12, %c0_13] : memref<8x128xf32, #tpu.memory_space<vmem>>, vector<8x32xf32>
    tpu.vector_store %arg7[%c0_12, %c0_13], %32 {strides = array<i32>} : memref<8x128xf32, #tpu.memory_space<vmem>>, vector<8x32xf32>,
    %c0_14 = arith.constant 0 : index
    %c0_15 = arith.constant 0 : index
    %35 = vector.load %arg7[%c0_14, %c0_15] : memref<8x128xf32, #tpu.memory_space<vmem>>, vector<8x128xf32>
    %36 = arith.index_cast %c0_i32_1 : i32 to index
    %c0_16 = arith.constant 0 : index
    %c0_17 = arith.constant 0 : index
    %37 = vector.load %arg6[%36, %c0_16, %c0_17] : memref<4x8x128xf32, #tpu.memory_space<vmem>>, vector<1x8x128xf32>
    %38 = vector.shape_cast %37 : vector<1x8x128xf32> to vector<8x128xf32>
    %39 = vector.shape_cast %35 : vector<8x128xf32> to vector<1x8x128xf32>
    tpu.vector_store %arg6[%36, %c0_16, %c0_17], %39 {strides = array<i32>} : memref<4x8x128xf32, #tpu.memory_space<vmem>>, vector<1x8x128xf32>,
    %c1_i32 = arith.constant 1 : i32
    %40 = arith.index_cast %c1_i32 : i32 to index
    %c0_18 = arith.constant 0 : index
    %c0_19 = arith.constant 0 : index
    %41 = vector.load %arg1[%40, %c0_18, %c0_19] : memref<4x8x128xf32, #tpu.memory_space<vmem>>, vector<1x8x128xf32>
    %42 = vector.shape_cast %41 : vector<1x8x128xf32> to vector<8x128xf32>
    %c0_20 = arith.constant 0 : index
    %c0_21 = arith.constant 0 : index
    %43 = vector.load %arg7[%c0_20, %c0_21] : memref<8x128xf32, #tpu.memory_space<vmem>>, vector<8x128xf32>
    %c0_22 = arith.constant 0 : index
    %c0_23 = arith.constant 0 : index
    %44 = vector.load %arg2[%c0_22, %c0_23] : memref<128x128xf32, #tpu.memory_space<vmem>>, vector<128x128xf32>
    %cst_24 = arith.constant dense<0.000000e+00> : vector<8x128xf32>
    %45 = tpu.matmul %43, %44, %cst_24 {dimension_numbers = #tpu.dot_dimension_numbers<[1], [0], [0], [1], [0, 0, 1, 1], [], []>} : vector<8x128xf32>, vector<128x128xf32>, vector<8x128xf32> -> vector<8x128xf32>
    %46 = arith.addf %42, %45 : vector<8x128xf32>
    %47 = arith.negf %46 : vector<8x128xf32>
    %48 = math.exp %47 : vector<8x128xf32>
    %cst_25 = arith.constant 1.000000e+00 : f32
    %49 = vector.broadcast %cst_25 : f32 to vector<8x128xf32>
    %50 = arith.addf %49, %48 : vector<8x128xf32>
    %51 = arith.divf %49, %50 : vector<8x128xf32>
    %52 = math.tanh %46 : vector<8x128xf32>
    %53 = tpu.iota {dimensions = array<i32: 1>} : vector<8x128xi32>
    %c64_i32_26 = arith.constant 64 : i32
    %54 = vector.broadcast %c64_i32_26 : i32 to vector<8x128xi32>
    %55 = arith.cmpi sge, %53, %54 : vector<8x128xi32>
    %c96_i32_27 = arith.constant 96 : i32
    %56 = vector.broadcast %c96_i32_27 : i32 to vector<8x128xi32>
    %57 = arith.cmpi slt, %53, %56 : vector<8x128xi32>
    %58 = arith.andi %55, %57 : vector<8x128xi1>
    %59 = arith.select %58, %52, %51 : vector<8x128xi1>, vector<8x128xf32>
    %60 = vector.extract_strided_slice %59 {offsets = [0, 0], sizes = [8, 32], strides = [1, 1]} : vector<8x128xf32> to vector<8x32xf32>
    %61 = vector.extract_strided_slice %59 {offsets = [0, 32], sizes = [8, 32], strides = [1, 1]} : vector<8x128xf32> to vector<8x32xf32>
    %62 = vector.extract_strided_slice %59 {offsets = [0, 64], sizes = [8, 32], strides = [1, 1]} : vector<8x128xf32> to vector<8x32xf32>
    %63 = vector.extract_strided_slice %59 {offsets = [0, 96], sizes = [8, 32], strides = [1, 1]} : vector<8x128xf32> to vector<8x32xf32>
    %c0_28 = arith.constant 0 : index
    %c0_29 = arith.constant 0 : index
    %64 = vector.load %arg8[%c0_28, %c0_29] : memref<8x32xf32, #tpu.memory_space<vmem>>, vector<8x32xf32>
    %65 = arith.mulf %61, %64 : vector<8x32xf32>
    %66 = arith.mulf %60, %62 : vector<8x32xf32>
    %67 = arith.addf %65, %66 : vector<8x32xf32>
    %68 = math.tanh %67 : vector<8x32xf32>
    %69 = arith.mulf %63, %68 : vector<8x32xf32>
    %c0_30 = arith.constant 0 : index
    %c0_31 = arith.constant 0 : index
    %70 = vector.load %arg8[%c0_30, %c0_31] : memref<8x32xf32, #tpu.memory_space<vmem>>, vector<8x32xf32>
    tpu.vector_store %arg8[%c0_30, %c0_31], %67 {strides = array<i32>} : memref<8x32xf32, #tpu.memory_space<vmem>>, vector<8x32xf32>,
    %c0_32 = arith.constant 0 : index
    %c0_33 = arith.constant 0 : index
    %71 = vector.load %arg7[%c0_32, %c0_33] : memref<8x128xf32, #tpu.memory_space<vmem>>, vector<8x32xf32>
    tpu.vector_store %arg7[%c0_32, %c0_33], %69 {strides = array<i32>} : memref<8x128xf32, #tpu.memory_space<vmem>>, vector<8x32xf32>,
    %c0_34 = arith.constant 0 : index
    %c0_35 = arith.constant 0 : index
    %72 = vector.load %arg7[%c0_34, %c0_35] : memref<8x128xf32, #tpu.memory_space<vmem>>, vector<8x128xf32>
    %73 = arith.index_cast %c1_i32 : i32 to index
    %c0_36 = arith.constant 0 : index
    %c0_37 = arith.constant 0 : index
    %74 = vector.load %arg6[%73, %c0_36, %c0_37] : memref<4x8x128xf32, #tpu.memory_space<vmem>>, vector<1x8x128xf32>
    %75 = vector.shape_cast %74 : vector<1x8x128xf32> to vector<8x128xf32>
    %76 = vector.shape_cast %72 : vector<8x128xf32> to vector<1x8x128xf32>
    tpu.vector_store %arg6[%73, %c0_36, %c0_37], %76 {strides = array<i32>} : memref<4x8x128xf32, #tpu.memory_space<vmem>>, vector<1x8x128xf32>,
    %c2_i32 = arith.constant 2 : i32
    %77 = arith.index_cast %c2_i32 : i32 to index
    %c0_38 = arith.constant 0 : index
    %c0_39 = arith.constant 0 : index
    %78 = vector.load %arg1[%77, %c0_38, %c0_39] : memref<4x8x128xf32, #tpu.memory_space<vmem>>, vector<1x8x128xf32>
    %79 = vector.shape_cast %78 : vector<1x8x128xf32> to vector<8x128xf32>
    %c0_40 = arith.constant 0 : index
    %c0_41 = arith.constant 0 : index
    %80 = vector.load %arg7[%c0_40, %c0_41] : memref<8x128xf32, #tpu.memory_space<vmem>>, vector<8x128xf32>
    %c0_42 = arith.constant 0 : index
    %c0_43 = arith.constant 0 : index
    %81 = vector.load %arg2[%c0_42, %c0_43] : memref<128x128xf32, #tpu.memory_space<vmem>>, vector<128x128xf32>
    %cst_44 = arith.constant dense<0.000000e+00> : vector<8x128xf32>
    %82 = tpu.matmul %80, %81, %cst_44 {dimension_numbers = #tpu.dot_dimension_numbers<[1], [0], [0], [1], [0, 0, 1, 1], [], []>} : vector<8x128xf32>, vector<128x128xf32>, vector<8x128xf32> -> vector<8x128xf32>
    %83 = arith.addf %79, %82 : vector<8x128xf32>
    %84 = arith.negf %83 : vector<8x128xf32>
    %85 = math.exp %84 : vector<8x128xf32>
    %cst_45 = arith.constant 1.000000e+00 : f32
    %86 = vector.broadcast %cst_45 : f32 to vector<8x128xf32>
    %87 = arith.addf %86, %85 : vector<8x128xf32>
    %88 = arith.divf %86, %87 : vector<8x128xf32>
    %89 = math.tanh %83 : vector<8x128xf32>
    %90 = tpu.iota {dimensions = array<i32: 1>} : vector<8x128xi32>
    %c64_i32_46 = arith.constant 64 : i32
    %91 = vector.broadcast %c64_i32_46 : i32 to vector<8x128xi32>
    %92 = arith.cmpi sge, %90, %91 : vector<8x128xi32>
    %c96_i32_47 = arith.constant 96 : i32
    %93 = vector.broadcast %c96_i32_47 : i32 to vector<8x128xi32>
    %94 = arith.cmpi slt, %90, %93 : vector<8x128xi32>
    %95 = arith.andi %92, %94 : vector<8x128xi1>
    %96 = arith.select %95, %89, %88 : vector<8x128xi1>, vector<8x128xf32>
    %97 = vector.extract_strided_slice %96 {offsets = [0, 0], sizes = [8, 32], strides = [1, 1]} : vector<8x128xf32> to vector<8x32xf32>
    %98 = vector.extract_strided_slice %96 {offsets = [0, 32], sizes = [8, 32], strides = [1, 1]} : vector<8x128xf32> to vector<8x32xf32>
    %99 = vector.extract_strided_slice %96 {offsets = [0, 64], sizes = [8, 32], strides = [1, 1]} : vector<8x128xf32> to vector<8x32xf32>
    %100 = vector.extract_strided_slice %96 {offsets = [0, 96], sizes = [8, 32], strides = [1, 1]} : vector<8x128xf32> to vector<8x32xf32>
    %c0_48 = arith.constant 0 : index
    %c0_49 = arith.constant 0 : index
    %101 = vector.load %arg8[%c0_48, %c0_49] : memref<8x32xf32, #tpu.memory_space<vmem>>, vector<8x32xf32>
    %102 = arith.mulf %98, %101 : vector<8x32xf32>
    %103 = arith.mulf %97, %99 : vector<8x32xf32>
    %104 = arith.addf %102, %103 : vector<8x32xf32>
    %105 = math.tanh %104 : vector<8x32xf32>
    %106 = arith.mulf %100, %105 : vector<8x32xf32>
    %c0_50 = arith.constant 0 : index
    %c0_51 = arith.constant 0 : index
    %107 = vector.load %arg8[%c0_50, %c0_51] : memref<8x32xf32, #tpu.memory_space<vmem>>, vector<8x32xf32>
    tpu.vector_store %arg8[%c0_50, %c0_51], %104 {strides = array<i32>} : memref<8x32xf32, #tpu.memory_space<vmem>>, vector<8x32xf32>,
    %c0_52 = arith.constant 0 : index
    %c0_53 = arith.constant 0 : index
    %108 = vector.load %arg7[%c0_52, %c0_53] : memref<8x128xf32, #tpu.memory_space<vmem>>, vector<8x32xf32>
    tpu.vector_store %arg7[%c0_52, %c0_53], %106 {strides = array<i32>} : memref<8x128xf32, #tpu.memory_space<vmem>>, vector<8x32xf32>,
    %c0_54 = arith.constant 0 : index
    %c0_55 = arith.constant 0 : index
    %109 = vector.load %arg7[%c0_54, %c0_55] : memref<8x128xf32, #tpu.memory_space<vmem>>, vector<8x128xf32>
    %110 = arith.index_cast %c2_i32 : i32 to index
    %c0_56 = arith.constant 0 : index
    %c0_57 = arith.constant 0 : index
    %111 = vector.load %arg6[%110, %c0_56, %c0_57] : memref<4x8x128xf32, #tpu.memory_space<vmem>>, vector<1x8x128xf32>
    %112 = vector.shape_cast %111 : vector<1x8x128xf32> to vector<8x128xf32>
    %113 = vector.shape_cast %109 : vector<8x128xf32> to vector<1x8x128xf32>
    tpu.vector_store %arg6[%110, %c0_56, %c0_57], %113 {strides = array<i32>} : memref<4x8x128xf32, #tpu.memory_space<vmem>>, vector<1x8x128xf32>,
    %c3_i32 = arith.constant 3 : i32
    %114 = arith.index_cast %c3_i32 : i32 to index
    %c0_58 = arith.constant 0 : index
    %c0_59 = arith.constant 0 : index
    %115 = vector.load %arg1[%114, %c0_58, %c0_59] : memref<4x8x128xf32, #tpu.memory_space<vmem>>, vector<1x8x128xf32>
    %116 = vector.shape_cast %115 : vector<1x8x128xf32> to vector<8x128xf32>
    %c0_60 = arith.constant 0 : index
    %c0_61 = arith.constant 0 : index
    %117 = vector.load %arg7[%c0_60, %c0_61] : memref<8x128xf32, #tpu.memory_space<vmem>>, vector<8x128xf32>
    %c0_62 = arith.constant 0 : index
    %c0_63 = arith.constant 0 : index
    %118 = vector.load %arg2[%c0_62, %c0_63] : memref<128x128xf32, #tpu.memory_space<vmem>>, vector<128x128xf32>
    %cst_64 = arith.constant dense<0.000000e+00> : vector<8x128xf32>
    %119 = tpu.matmul %117, %118, %cst_64 {dimension_numbers = #tpu.dot_dimension_numbers<[1], [0], [0], [1], [0, 0, 1, 1], [], []>} : vector<8x128xf32>, vector<128x128xf32>, vector<8x128xf32> -> vector<8x128xf32>
    %120 = arith.addf %116, %119 : vector<8x128xf32>
    %121 = arith.negf %120 : vector<8x128xf32>
    %122 = math.exp %121 : vector<8x128xf32>
    %cst_65 = arith.constant 1.000000e+00 : f32
    %123 = vector.broadcast %cst_65 : f32 to vector<8x128xf32>
    %124 = arith.addf %123, %122 : vector<8x128xf32>
    %125 = arith.divf %123, %124 : vector<8x128xf32>
    %126 = math.tanh %120 : vector<8x128xf32>
    %127 = tpu.iota {dimensions = array<i32: 1>} : vector<8x128xi32>
    %c64_i32_66 = arith.constant 64 : i32
    %128 = vector.broadcast %c64_i32_66 : i32 to vector<8x128xi32>
    %129 = arith.cmpi sge, %127, %128 : vector<8x128xi32>
    %c96_i32_67 = arith.constant 96 : i32
    %130 = vector.broadcast %c96_i32_67 : i32 to vector<8x128xi32>
    %131 = arith.cmpi slt, %127, %130 : vector<8x128xi32>
    %132 = arith.andi %129, %131 : vector<8x128xi1>
    %133 = arith.select %132, %126, %125 : vector<8x128xi1>, vector<8x128xf32>
    %134 = vector.extract_strided_slice %133 {offsets = [0, 0], sizes = [8, 32], strides = [1, 1]} : vector<8x128xf32> to vector<8x32xf32>
    %135 = vector.extract_strided_slice %133 {offsets = [0, 32], sizes = [8, 32], strides = [1, 1]} : vector<8x128xf32> to vector<8x32xf32>
    %136 = vector.extract_strided_slice %133 {offsets = [0, 64], sizes = [8, 32], strides = [1, 1]} : vector<8x128xf32> to vector<8x32xf32>
    %137 = vector.extract_strided_slice %133 {offsets = [0, 96], sizes = [8, 32], strides = [1, 1]} : vector<8x128xf32> to vector<8x32xf32>
    %c0_68 = arith.constant 0 : index
    %c0_69 = arith.constant 0 : index
    %138 = vector.load %arg8[%c0_68, %c0_69] : memref<8x32xf32, #tpu.memory_space<vmem>>, vector<8x32xf32>
    %139 = arith.mulf %135, %138 : vector<8x32xf32>
    %140 = arith.mulf %134, %136 : vector<8x32xf32>
    %141 = arith.addf %139, %140 : vector<8x32xf32>
    %142 = math.tanh %141 : vector<8x32xf32>
    %143 = arith.mulf %137, %142 : vector<8x32xf32>
    %c0_70 = arith.constant 0 : index
    %c0_71 = arith.constant 0 : index
    %144 = vector.load %arg8[%c0_70, %c0_71] : memref<8x32xf32, #tpu.memory_space<vmem>>, vector<8x32xf32>
    tpu.vector_store %arg8[%c0_70, %c0_71], %141 {strides = array<i32>} : memref<8x32xf32, #tpu.memory_space<vmem>>, vector<8x32xf32>,
    %c0_72 = arith.constant 0 : index
    %c0_73 = arith.constant 0 : index
    %145 = vector.load %arg7[%c0_72, %c0_73] : memref<8x128xf32, #tpu.memory_space<vmem>>, vector<8x32xf32>
    tpu.vector_store %arg7[%c0_72, %c0_73], %143 {strides = array<i32>} : memref<8x128xf32, #tpu.memory_space<vmem>>, vector<8x32xf32>,
    %c0_74 = arith.constant 0 : index
    %c0_75 = arith.constant 0 : index
    %146 = vector.load %arg7[%c0_74, %c0_75] : memref<8x128xf32, #tpu.memory_space<vmem>>, vector<8x128xf32>
    %147 = arith.index_cast %c3_i32 : i32 to index
    %c0_76 = arith.constant 0 : index
    %c0_77 = arith.constant 0 : index
    %148 = vector.load %arg6[%147, %c0_76, %c0_77] : memref<4x8x128xf32, #tpu.memory_space<vmem>>, vector<1x8x128xf32>
    %149 = vector.shape_cast %148 : vector<1x8x128xf32> to vector<8x128xf32>
    %150 = vector.shape_cast %146 : vector<8x128xf32> to vector<1x8x128xf32>
    tpu.vector_store %arg6[%147, %c0_76, %c0_77], %150 {strides = array<i32>} : memref<4x8x128xf32, #tpu.memory_space<vmem>>, vector<1x8x128xf32>,
    %c4_i32 = arith.constant 4 : i32
    %c0_78 = arith.constant 0 : index
    %c0_79 = arith.constant 0 : index
    %c0_80 = arith.constant 0 : index
    %151 = vector.load %arg6[%c0_78, %c0_79, %c0_80] : memref<4x8x128xf32, #tpu.memory_space<vmem>>, vector<4x8x128xf32>
    %152 = vector.shape_cast %151 : vector<4x8x128xf32> to vector<32x128xf32>
    %c0_81 = arith.constant 0 : index
    %c0_82 = arith.constant 0 : index
    %153 = vector.load %arg3[%c0_81, %c0_82] : memref<128x128xf32, #tpu.memory_space<vmem>>, vector<128x128xf32>
    %cst_83 = arith.constant dense<0.000000e+00> : vector<32x128xf32>
    %154 = tpu.matmul %152, %153, %cst_83 {dimension_numbers = #tpu.dot_dimension_numbers<[1], [0], [0], [1], [0, 0, 1, 1], [], []>} : vector<32x128xf32>, vector<128x128xf32>, vector<32x128xf32> -> vector<32x128xf32>
    %c0_84 = arith.constant 0 : index
    %c0_85 = arith.constant 0 : index
    %155 = vector.load %arg4[%c0_84, %c0_85] : memref<1x128xf32, #tpu.memory_space<vmem>>, vector<1x128xf32>
    %156 = vector.broadcast %155 : vector<1x128xf32> to vector<32x128xf32>
    %157 = arith.addf %154, %156 : vector<32x128xf32>
    %158 = arith.negf %157 : vector<32x128xf32>
    %159 = math.exp %158 : vector<32x128xf32>
    %cst_86 = arith.constant 1.000000e+00 : f32
    %160 = vector.broadcast %cst_86 : f32 to vector<32x128xf32>
    %161 = arith.addf %160, %159 : vector<32x128xf32>
    %162 = arith.divf %160, %161 : vector<32x128xf32>
    %163 = vector.shape_cast %162 : vector<32x128xf32> to vector<4x8x128xf32>
    %c0_87 = arith.constant 0 : index
    %c0_88 = arith.constant 0 : index
    %c0_89 = arith.constant 0 : index
    %164 = vector.load %arg5[%c0_87, %c0_88, %c0_89] : memref<4x8x128xf32, #tpu.memory_space<vmem>>, vector<4x8x128xf32>
    tpu.vector_store %arg5[%c0_87, %c0_88, %c0_89], %163 {strides = array<i32>} : memref<4x8x128xf32, #tpu.memory_space<vmem>>, vector<4x8x128xf32>,
    return
  }
  func.func @transform_0(%arg0: i32) -> (i32, i32, i32) {
    %c0_i32 = arith.constant 0 : i32
    %c0_i32_0 = arith.constant 0 : i32
    %c0_i32_1 = arith.constant 0 : i32
    return %arg0, %c0_i32, %c0_i32_0 : i32, i32, i32
  }
  func.func @transform_1(%arg0: i32) -> (i32, i32) {
    %c0_i32 = arith.constant 0 : i32
    %c0_i32_0 = arith.constant 0 : i32
    %c0_i32_1 = arith.constant 0 : i32
    return %c0_i32, %c0_i32_0 : i32, i32
  }
  func.func @transform_2(%arg0: i32) -> (i32, i32) {
    %c0_i32 = arith.constant 0 : i32
    %c0_i32_0 = arith.constant 0 : i32
    %c0_i32_1 = arith.constant 0 : i32
    return %c0_i32, %c0_i32_0 : i32, i32
  }
  func.func @transform_3(%arg0: i32) -> (i32, i32) {
    %c0_i32 = arith.constant 0 : i32
    %c0_i32_0 = arith.constant 0 : i32
    %c0_i32_1 = arith.constant 0 : i32
    return %c0_i32, %c0_i32_0 : i32, i32
  }
  func.func @transform_4(%arg0: i32) -> (i32, i32, i32) {
    %c0_i32 = arith.constant 0 : i32
    %c0_i32_0 = arith.constant 0 : i32
    %c0_i32_1 = arith.constant 0 : i32
    return %arg0, %c0_i32, %c0_i32_0 : i32, i32, i32
  }
}

</mosaic_0001>

<bundles_post_ra>
// kernel: sekt_forward_q.1
= control target key start
LH: loop header
LB: loop body
LE: loop exit
PB: predicated region body
PF: predicated region fallthrough
CT: control target
= control target key end

     0   :  { %s1331_s15 = smov 0   ;;  %s1681_s0 = inlined_call_operand.vmem [shape: f32[8,8,128], index: 0, kind: input, shape index: {}]   ;;  %s1682_s1 = inlined_call_operand.vmem [shape: f32[128,128], index: 1, kind: input, shape index: {}]   ;;  %s1683_s2 = inlined_call_operand.vmem [shape: f32[128,128], index: 2, kind: input, shape index: {}]   ;;  %s1684_s3 = inlined_call_operand.vmem [shape: f32[1,128], index: 3, kind: input, shape index: {}]   ;;  %s1685_s4 = inlined_call_operand.vmem [shape: f32[8,8,128], index: 4, kind: output, shape index: {}]  }
   0x1 LB: > { %s940_s16 = sadd.s32 4294967295, %s1298_s15   ;;  %p944_p0 = scmp.ge.s32.totalorder %s1298_s15, 1  ;;  %s1298_s15 = sphi %s1331_s15, %s14_s15  }
   0x2   : > { %p163_p1 = scmp.lt.s32.totalorder %s1298_s15, 3 }
   0x4   : > { %p164_p2 = pnand %p944_p0, %p163_p1 }
   0x5   : > { %s945_s17 = sshll.u32 (!%p164_p2), %s940_s16, 2  ;;  %p949_p4 = scmp.ne.s32.totalorder (!%p164_p2), %s940_s16, 0 }
   0x6   : > { %167 = sbr.rel (%p164_p2) target bundleno = 3146 (0xc4a), region = 36  ;;  %p190_p3 = scmp.lt.s32.totalorder (!%p164_p2), %s945_s17, 7 }
   0xb   : > { %s1689_s17 = smov (!%p190_p3, %s945_s17), 7  ;;  %204 = sbr.rel (%p949_p4) target bundleno = 18 (0x12), region = 40 }
   0xc   : > { %s946_s18 = sshll.u32 %s1689_s17, 3 }
   0xd   : > { %s1342_s21 = scalar_lea.vmem %s1681_s0, %s946_s18  ;;  %s1347_s24 = scalar_lea.vmem %s1685_s4, %s946_s18 }
  0x10   : > { %vm206_vm0 = vcmask 261120   ;;  %v1300_v0 = vmov 0.0  }
  0x11   : > { %205 = vst [vmem:[#allocation3] sm:$0xff] %v1300_v0  ;;  %207 = vst.msk [vmem:[#allocation4] sm:$0xff] %vm206_vm0, %v1300_v0 }
  0x12 PF: > { %v1352_v1 = vld [vmem:[%s1682_s1 + $0x78] sm:$0xff]  ;;  %v1301_v2 = vmov 0.0   ;;  %v1358_v3 = vld [vmem:[%s1682_s1 + $0x70] sm:$0xff]  ;;  %vm1302_vm1 = vmmov 0   ;;  %v1368_v4 = vld [vmem:[%s1682_s1 + $0x68] sm:$0xff]  ;;  %v304_v26 = vlaneseq  ;;  %s1303_s8 = smov 64  }
  0x13   : > { %1052 = vmatprep.subr.mxu1 %v1301_v2  ;;  %1084 = vmatprep.mubr.msk.f32.mxu1 %vm1302_vm1, %v1301_v2  ;;  %v1377_v5 = vld [vmem:[%s1682_s1 + $0x60] sm:$0xff]  ;;  %v1386_v6 = vld [vmem:[%s1682_s1 + $0x58] sm:$0xff]  ;;  %v1395_v7 = vld [vmem:[%s1682_s1 + $0x50] sm:$0xff]  ;;  %s1304_s9 = smov 32   ;;  %s1305_s10 = smov 96   ;;  %vm336_vm5 = vcmask 261120  }
  0x14   : > { %1053 = vmatpush3.msra.mxu1 %v1352_v1  ;;  %1122 = vmatprep.subr.mxu0 %v1301_v2  ;;  %v1404_v8 = vld [vmem:[%s1682_s1 + $0x48] sm:$0xff]  ;;  %v1413_v9 = vld [vmem:[%s1682_s1 + $0x40] sm:$0xff]  ;;  %v1422_v10 = vld [vmem:[%s1682_s1 + $0x38] sm:$0xff]  ;;  %v305_v27 = vand.u32 127, %v304_v26 }
  0x15   : > { %1054 = vmatprep.subr.mxu1 %v1301_v2  ;;  %1123 = vmatpush3.msra.mxu0 %v1352_v1  ;;  %v1431_v11 = vld [vmem:[%s1682_s1 + $0x30] sm:$0xff]  ;;  %v1440_v12 = vld [vmem:[%s1682_s1 + $0x28] sm:$0xff]  ;;  %v1449_v13 = vld [vmem:[%s1682_s1 + $0x20] sm:$0xff] }
  0x16   : > { %1055 = vmatpush3.msra.mxu1 %v1358_v3  ;;  %1124 = vmatprep.subr.mxu0 %v1301_v2  ;;  %v1458_v14 = vld [vmem:[%s1682_s1 + $0x18] sm:$0xff]  ;;  %v1467_v15 = vld [vmem:[%s1682_s1 + $0x10] sm:$0xff]  ;;  %v1476_v16 = vld [vmem:[%s1682_s1 + $0x8] sm:$0xff]  ;;  %vm306_vm2 = vcmp.ge.s32.totalorder %v305_v27, 64  ;;  %vm307_vm3 = vcmp.lt.s32.totalorder %v305_v27, 96 }
  0x17   : > { %1056 = vmatprep.subr.mxu1 %v1301_v2  ;;  %1125 = vmatpush3.msra.mxu0 %v1358_v3  ;;  %v1485_v17 = vld [vmem:[%s1682_s1] sm:$0xff]  ;;  %vm1533_vm4 = vmand %vm306_vm2, %vm307_vm3  ;;  %v951_v46 = vld [vmem:[%s1342_s21 + $0x8] sm:$0xff] }
  0x18   : > { %1057 = vmatpush3.msra.mxu1 %v1368_v4  ;;  %1126 = vmatprep.subr.mxu0 %v1301_v2  ;;  %v209_v18 = vld [vmem:[#allocation3] sm:$0xff]  ;;  %v310_v32 = vld [vmem:[#allocation4] sm:$0xff]  ;;  %v763_v63 = vld [vmem:[%s1683_s2 + $0x78] sm:$0xff] }
  0x19   : > { %1058 = vmatprep.subr.mxu1 %v1301_v2  ;;  %1127 = vmatpush3.msra.mxu0 %v1368_v4  ;;  %v208_v19 = vld [vmem:[%s1342_s21] sm:$0xff] }
  0x1a   : > { %1059 = vmatpush3.msra.mxu1 %v1377_v5  ;;  %1128 = vmatprep.subr.mxu0 %v1301_v2 }
  0x1b   : > { %1060 = vmatprep.subr.mxu1 %v1301_v2  ;;  %1129 = vmatpush3.msra.mxu0 %v1377_v5 }
  0x1c   : > { %1061 = vmatpush3.msra.mxu1 %v1386_v6  ;;  %1130 = vmatprep.subr.mxu0 %v1301_v2 }
  0x1d   : > { %1062 = vmatprep.subr.mxu1 %v1301_v2  ;;  %1131 = vmatpush3.msra.mxu0 %v1386_v6 }
  0x1e   : > { %1063 = vmatpush3.msra.mxu1 %v1395_v7  ;;  %1132 = vmatprep.subr.mxu0 %v1301_v2 }
  0x1f   : > { %1064 = vmatprep.subr.mxu1 %v1301_v2  ;;  %1133 = vmatpush3.msra.mxu0 %v1395_v7 }
  0x20   : > { %1065 = vmatpush3.msra.mxu1 %v1404_v8  ;;  %1134 = vmatprep.subr.mxu0 %v1301_v2 }
  0x21   : > { %1066 = vmatprep.subr.mxu1 %v1301_v2  ;;  %1135 = vmatpush3.msra.mxu0 %v1404_v8 }
  0x22   : > { %1067 = vmatpush3.msra.mxu1 %v1413_v9  ;;  %1136 = vmatprep.subr.mxu0 %v1301_v2 }
  0x23   : > { %1068 = vmatprep.subr.mxu1 %v1301_v2  ;;  %1137 = vmatpush3.msra.mxu0 %v1413_v9 }
  0x24   : > { %1069 = vmatpush3.msra.mxu1 %v1422_v10  ;;  %1138 = vmatprep.subr.mxu0 %v1301_v2 }
  0x25   : > { %1070 = vmatprep.subr.mxu1 %v1301_v2  ;;  %1139 = vmatpush3.msra.mxu0 %v1422_v10 }
  0x26   : > { %1071 = vmatpush3.msra.mxu1 %v1431_v11  ;;  %1140 = vmatprep.subr.mxu0 %v1301_v2 }
  0x27   : > { %1072 = vmatprep.subr.mxu1 %v1301_v2  ;;  %1141 = vmatpush3.msra.mxu0 %v1431_v11 }
  0x28   : > { %1073 = vmatpush3.msra.mxu1 %v1440_v12  ;;  %1142 = vmatprep.subr.mxu0 %v1301_v2 }
  0x29   : > { %1074 = vmatprep.subr.mxu1 %v1301_v2  ;;  %1143 = vmatpush3.msra.mxu0 %v1440_v12 }
  0x2a   : > { %1075 = vmatpush3.msra.mxu1 %v1449_v13  ;;  %1144 = vmatprep.subr.mxu0 %v1301_v2 }
  0x2b   : > { %1076 = vmatprep.subr.mxu1 %v1301_v2  ;;  %1145 = vmatpush3.msra.mxu0 %v1449_v13 }
  0x2c   : > { %1077 = vmatpush3.msra.mxu1 %v1458_v14  ;;  %1146 = vmatprep.subr.mxu0 %v1301_v2 }
  0x2d   : > { %1078 = vmatprep.subr.mxu1 %v1301_v2  ;;  %1147 = vmatpush3.msra.mxu0 %v1458_v14 }
  0x2e   : > { %1079 = vmatpush3.msra.mxu1 %v1467_v15  ;;  %1148 = vmatprep.subr.mxu0 %v1301_v2 }
  0x2f   : > { %1080 = vmatprep.subr.mxu1 %v1301_v2  ;;  %1149 = vmatpush3.msra.mxu0 %v1467_v15 }
  0x30   : > { %1081 = vmatpush3.msra.mxu1 %v1476_v16  ;;  %1150 = vmatprep.subr.mxu0 %v1301_v2 }
  0x31   : > { %1082 = vmatprep.subr.mxu1 %v1301_v2  ;;  %1151 = vmatpush3.msra.mxu0 %v1476_v16 }
  0x32   : > { %1083 = vmatpush3.msra.mxu1 %v1485_v17  ;;  %1152 = vmatprep.subr.mxu0 %v1301_v2 }
  0x33   : > { %1085 = vmatmul.mubr.f32.vlgmr.msra.gmra.mxu1 %v209_v18  ;;  %1087 = vmatprep.subr.mxu1 %v1301_v2  ;;  %v750_v18 = vld [vmem:[%s1683_s2 + $0x10] sm:$0xff] }
  0x34   : > { %1088 = vmatpush3.msra.mxu1 %v1352_v1  ;;  %1119 = vmatprep.mubr.msk.f32.mxu1 %vm1302_vm1, %v1301_v2 }
  0x35   : > { %1089 = vmatprep.subr.mxu1 %v1301_v2  ;;  %1153 = vmatpush3.msra.mxu0 %v1485_v17 }
  0x36   : > { %1090 = vmatpush3.msra.mxu1 %v1358_v3  ;;  %1154 = vmatprep.mubr.msk.f32.mxu0 %vm1302_vm1, %v1301_v2 }
  0x37   : > { %1091 = vmatprep.subr.mxu1 %v1301_v2  ;;  %1192 = vmatprep.subr.mxu0 %v763_v63 }
  0x38   : > { %1092 = vmatpush3.msra.mxu1 %v1368_v4 }
  0x39   : > { %1093 = vmatprep.subr.mxu1 %v1301_v2 }
  0x3a   : > { %1094 = vmatpush3.msra.mxu1 %v1377_v5 }
  0x3b   : > { %1095 = vmatprep.subr.mxu1 %v1301_v2 }
  0x3c   : > { %1096 = vmatpush3.msra.mxu1 %v1386_v6 }
  0x3d   : > { %1097 = vmatprep.subr.mxu1 %v1301_v2 }
  0x3e   : > { %1098 = vmatpush3.msra.mxu1 %v1395_v7 }
  0x3f   : > { %1099 = vmatprep.subr.mxu1 %v1301_v2 }
  0x40   : > { %1100 = vmatpush3.msra.mxu1 %v1404_v8 }
  0x41   : > { %1101 = vmatprep.subr.mxu1 %v1301_v2 }
  0x42   : > { %1102 = vmatpush3.msra.mxu1 %v1413_v9 }
  0x43   : > { %1103 = vmatprep.subr.mxu1 %v1301_v2 }
  0x44   : > { %1104 = vmatpush3.msra.mxu1 %v1422_v10 }
  0x45   : > { %1105 = vmatprep.subr.mxu1 %v1301_v2 }
  0x46   : > { %1106 = vmatpush3.msra.mxu1 %v1431_v11 }
  0x47   : > { %1107 = vmatprep.subr.mxu1 %v1301_v2 }
  0x48   : > { %1108 = vmatpush3.msra.mxu1 %v1440_v12 }
  0x49   : > { %1109 = vmatprep.subr.mxu1 %v1301_v2 }
  0x4a   : > { %1110 = vmatpush3.msra.mxu1 %v1449_v13 }
  0x4b   : > { %1111 = vmatprep.subr.mxu1 %v1301_v2 }
  0x4c   : > { %1112 = vmatpush3.msra.mxu1 %v1458_v14 }
  0x4d   : > { %1113 = vmatprep.subr.mxu1 %v1301_v2 }
  0x4e   : > { %1114 = vmatpush3.msra.mxu1 %v1467_v15 }
  0x4f   : > { %1115 = vmatprep.subr.mxu1 %v1301_v2 }
  0x50   : > { %1116 = vmatpush3.msra.mxu1 %v1476_v16 }
  0x51   : > { %1117 = vmatprep.subr.mxu1 %v1301_v2 }
  0x52   : > { %1118 = vmatpush3.msra.mxu1 %v1485_v17 }
  0x53   : > { %1157 = vmatprep.subr.mxu1 %v1301_v2 }
  0xf3   : > { %v292_v20 = vpop.f32.mrf.mxu1 }
  0xf4   : > { %v296_v21 = vadd.f32 %v292_v20, %v208_v19  ;;  %v749_v19 = vld [vmem:[%s1683_s2 + $0x8] sm:$0xff]  ;;  %v748_v20 = vld [vmem:[%s1683_s2] sm:$0xff] }
  0xf5   : > { %v1086_v22 = vpop.f32.mrf.mxu1 }
  0xf6   : > { %v950_v23 = vmul.f32 -1.442695, %v296_v21 }
  0xf8   : > { %1244 = vpow2.f32 %v950_v23 }
  0xf9   : > { %1246 = vtanh.f32 %v296_v21  ;;  %v953_v21 = vld [vmem:[%s1342_s21 + $0x10] sm:$0xff] }
 0x105   : > { %v1245_v24 = vpop.eup %1244 }
 0x106   : > { %v300_v25 = vadd.f32 1.0, %v1245_v24  ;;  %v1247_v29 = vpop.eup %1246 }
 0x108   : > { %1248 = vrcp.f32 %v300_v25 }
 0x115   : > { %v1249_v30 = vpop.eup %1248 }
 0x116   : > { %v309_v31 = vsel %vm1533_vm4, %v1247_v29, %v1249_v30  ;;  %v1648_v29 = vld [vmem:[%s1684_s3] ss:$0 sm:$0xff] }
 0x117   : > { %317 = vrot.lane.b32.xlu0 %v309_v31, %s1303_s8 }
 0x11b   : > { %312 = vrot.lane.b32.xlu0 %v310_v32, %s1304_s9 }
 0x189   : > { %v318_v33 = vpop.permute.xlu0 %317 }
 0x18a   : > { %v320_v34 = vmul.f32 %v318_v33, %v309_v31 }
 0x18c   : > { %322 = vrot.lane.b32.xlu1 %v320_v34, %s1304_s9 }
 0x18d   : > { %v313_v35 = vpop.permute.xlu0 %312 }
 0x18e   : > { %v315_v36 = vmul.f32 %v313_v35, %v309_v31 }
 0x1fe   : > { %v323_v37 = vpop.permute.xlu1 %322 }
 0x1ff   : > { %v325_v38 = vadd.f32 %v323_v37, %v315_v36 }
 0x201   : > { %1250 = vtanh.f32 %v325_v38 }
 0x20e   : > { %v1251_v39 = vpop.eup %1250 }
 0x20f   : > { %328 = vrot.lane.b32.xlu1 %v1251_v39, %s1303_s8 }
 0x213   : > { %333 = vrot.lane.b32.xlu1 %v325_v38, %s1305_s10 }
 0x281   : > { %v329_v40 = vpop.permute.xlu1 %328 }
 0x282   : > { %v331_v41 = vmul.f32 %v329_v40, %v309_v31 }
 0x284   : > { %339 = vrot.lane.b32.xlu0 %v331_v41, %s1304_s9 }
 0x285   : > { %v334_v42 = vpop.permute.xlu1 %333 }
 0x286   : > { %337 = vst.msk [vmem:[#allocation4] sm:$0xff] %vm336_vm5, %v334_v42 }
 0x28d   : > { %v443_v43 = vld [vmem:[#allocation4] sm:$0xff] }
 0x28e   : > { %445 = vrot.lane.b32.xlu1 %v443_v43, %s1304_s9 }
 0x2f6   : > { %v340_v44 = vpop.permute.xlu0 %339 }
 0x2f7   : > { %342 = vst.msk [vmem:[#allocation3] sm:$0xff] %vm336_vm5, %v340_v44 }
 0x2fe   : > { %v1548_v45 = vld [vmem:[#allocation3] sm:$0xff] }
 0x2ff   : > { %1120 = vmatmul.mubr.f32.vlgmr.msra.gmra.mxu1 %v1548_v45 }
 0x300   : > { %1158 = vmatpush3.msra.mxu1 %v1352_v1  ;;  %1189 = vmatprep.mubr.msk.f32.mxu1 %vm1302_vm1, %v1301_v2  ;;  %v446_v58 = vpop.permute.xlu1 %445 }
 0x301   : > { %1159 = vmatprep.subr.mxu1 %v1301_v2 }
 0x302   : > { %1160 = vmatpush3.msra.mxu1 %v1358_v3 }
 0x303   : > { %1161 = vmatprep.subr.mxu1 %v1301_v2 }
 0x304   : > { %1162 = vmatpush3.msra.mxu1 %v1368_v4 }
 0x305   : > { %1163 = vmatprep.subr.mxu1 %v1301_v2 }
 0x306   : > { %1164 = vmatpush3.msra.mxu1 %v1377_v5 }
 0x307   : > { %1165 = vmatprep.subr.mxu1 %v1301_v2 }
 0x308   : > { %1166 = vmatpush3.msra.mxu1 %v1386_v6  ;;  %v762_v6 = vld [vmem:[%s1683_s2 + $0x70] sm:$0xff] }
 0x309   : > { %1167 = vmatprep.subr.mxu1 %v1301_v2 }
 0x30a   : > { %1168 = vmatpush3.msra.mxu1 %v1395_v7  ;;  %v761_v7 = vld [vmem:[%s1683_s2 + $0x68] sm:$0xff] }
 0x30b   : > { %1169 = vmatprep.subr.mxu1 %v1301_v2 }
 0x30c   : > { %1170 = vmatpush3.msra.mxu1 %v1404_v8  ;;  %v760_v8 = vld [vmem:[%s1683_s2 + $0x60] sm:$0xff] }
 0x30d   : > { %1171 = vmatprep.subr.mxu1 %v1301_v2 }
 0x30e   : > { %1172 = vmatpush3.msra.mxu1 %v1413_v9  ;;  %v759_v9 = vld [vmem:[%s1683_s2 + $0x58] sm:$0xff] }
 0x30f   : > { %1173 = vmatprep.subr.mxu1 %v1301_v2 }
 0x310   : > { %1174 = vmatpush3.msra.mxu1 %v1422_v10  ;;  %v758_v10 = vld [vmem:[%s1683_s2 + $0x50] sm:$0xff] }
 0x311   : > { %1175 = vmatprep.subr.mxu1 %v1301_v2 }
 0x312   : > { %1176 = vmatpush3.msra.mxu1 %v1431_v11  ;;  %v757_v11 = vld [vmem:[%s1683_s2 + $0x48] sm:$0xff] }
 0x313   : > { %1177 = vmatprep.subr.mxu1 %v1301_v2 }
 0x314   : > { %1178 = vmatpush3.msra.mxu1 %v1440_v12  ;;  %v756_v12 = vld [vmem:[%s1683_s2 + $0x40] sm:$0xff] }
 0x315   : > { %1179 = vmatprep.subr.mxu1 %v1301_v2 }
 0x316   : > { %1180 = vmatpush3.msra.mxu1 %v1449_v13  ;;  %v755_v13 = vld [vmem:[%s1683_s2 + $0x38] sm:$0xff] }
 0x317   : > { %1181 = vmatprep.subr.mxu1 %v1301_v2 }
 0x318   : > { %1182 = vmatpush3.msra.mxu1 %v1458_v14  ;;  %v754_v14 = vld [vmem:[%s1683_s2 + $0x30] sm:$0xff] }
 0x319   : > { %1183 = vmatprep.subr.mxu1 %v1301_v2 }
 0x31a   : > { %1184 = vmatpush3.msra.mxu1 %v1467_v15  ;;  %v753_v15 = vld [vmem:[%s1683_s2 + $0x28] sm:$0xff] }
 0x31b   : > { %1185 = vmatprep.subr.mxu1 %v1301_v2 }
 0x31c   : > { %1186 = vmatpush3.msra.mxu1 %v1476_v16  ;;  %v752_v16 = vld [vmem:[%s1683_s2 + $0x20] sm:$0xff] }
 0x31d   : > { %1187 = vmatprep.subr.mxu1 %v1301_v2 }
 0x31e   : > { %1188 = vmatpush3.msra.mxu1 %v1485_v17  ;;  %v751_v17 = vld [vmem:[%s1683_s2 + $0x18] sm:$0xff] }
 0x3bf   : > { %v430_v47 = vpop.f32.mrf.mxu1 }
 0x3c0   : > { %v434_v48 = vadd.f32 %v951_v46, %v430_v47 }
 0x3c1   : > { %v1121_v49 = vpop.f32.mrf.mxu1 }
 0x3c2   : > { %v952_v50 = vmul.f32 -1.442695, %v434_v48 }
 0x3c4   : > { %1252 = vpow2.f32 %v952_v50 }
 0x3c5   : > { %1254 = vtanh.f32 %v434_v48 }
 0x3d1   : > { %v1253_v51 = vpop.eup %1252 }
 0x3d2   : > { %v438_v52 = vadd.f32 1.0, %v1253_v51  ;;  %v1255_v53 = vpop.eup %1254 }
 0x3d4   : > { %1256 = vrcp.f32 %v438_v52 }
 0x3e1   : > { %v1257_v54 = vpop.eup %1256 }
 0x3e2   : > { %v442_v55 = vsel %vm1533_vm4, %v1255_v53, %v1257_v54 }
 0x3e3   : > { %450 = vrot.lane.b32.xlu0 %v442_v55, %s1303_s8  ;;  %v448_v59 = vmul.f32 %v446_v58, %v442_v55  ;;  %v955_v58 = vld [vmem:[%s1342_s21 + $0x18] sm:$0xff] }
 0x455   : > { %v451_v56 = vpop.permute.xlu0 %450 }
 0x456   : > { %v453_v57 = vmul.f32 %v451_v56, %v442_v55 }
 0x458   : > { %455 = vrot.lane.b32.xlu0 %v453_v57, %s1304_s9 }
 0x4ca   : > { %v456_v60 = vpop.permute.xlu0 %455 }
 0x4cb   : > { %v458_v61 = vadd.f32 %v456_v60, %v448_v59 }
 0x4cd   : > { %1258 = vtanh.f32 %v458_v61 }
 0x4da   : > { %v1259_v62 = vpop.eup %1258 }
 0x4db   : > { %461 = vrot.lane.b32.xlu1 %v1259_v62, %s1303_s8 }
 0x4df   : > { %466 = vrot.lane.b32.xlu1 %v458_v61, %s1305_s10 }
 0x54d   : > { %v462_v0 = vpop.permute.xlu1 %461 }
 0x54e   : > { %v464_v1 = vmul.f32 %v462_v0, %v442_v55 }
 0x550   : > { %471 = vrot.lane.b32.xlu0 %v464_v1, %s1304_s9 }
 0x551   : > { %v467_v2 = vpop.permute.xlu1 %466 }
 0x552   : > { %469 = vst.msk [vmem:[#allocation4] sm:$0xff] %vm336_vm5, %v467_v2 }
 0x559   : > { %v576_v3 = vld [vmem:[#allocation4] sm:$0xff] }
 0x55a   : > { %578 = vrot.lane.b32.xlu1 %v576_v3, %s1304_s9 }
 0x5c2   : > { %v472_v4 = vpop.permute.xlu0 %471 }
 0x5c3   : > { %474 = vst.msk [vmem:[#allocation3] sm:$0xff] %vm336_vm5, %v472_v4 }
 0x5ca   : > { %v480_v5 = vld [vmem:[#allocation3] sm:$0xff] }
 0x5cb   : > { %1155 = vmatmul.mubr.f32.vlgmr.msra.gmra.mxu0 %v480_v5 }
 0x5cc   : > { %1193 = vmatpush3.msra.mxu0 %v763_v63  ;;  %1224 = vmatprep.mubr.f32.mxu0 %v1548_v45  ;;  %v579_v47 = vpop.permute.xlu1 %578 }
 0x5cd   : > { %1194 = vmatprep.subr.mxu0 %v762_v6 }
 0x5ce   : > { %1195 = vmatpush3.msra.mxu0 %v762_v6 }
 0x5cf   : > { %1196 = vmatprep.subr.mxu0 %v761_v7 }
 0x5d0   : > { %1197 = vmatpush3.msra.mxu0 %v761_v7 }
 0x5d1   : > { %1198 = vmatprep.subr.mxu0 %v760_v8 }
 0x5d2   : > { %1199 = vmatpush3.msra.mxu0 %v760_v8 }
 0x5d3   : > { %1200 = vmatprep.subr.mxu0 %v759_v9 }
 0x5d4   : > { %1201 = vmatpush3.msra.mxu0 %v759_v9 }
 0x5d5   : > { %1202 = vmatprep.subr.mxu0 %v758_v10 }
 0x5d6   : > { %1203 = vmatpush3.msra.mxu0 %v758_v10 }
 0x5d7   : > { %1204 = vmatprep.subr.mxu0 %v757_v11 }
 0x5d8   : > { %1205 = vmatpush3.msra.mxu0 %v757_v11 }
 0x5d9   : > { %1206 = vmatprep.subr.mxu0 %v756_v12 }
 0x5da   : > { %1207 = vmatpush3.msra.mxu0 %v756_v12 }
 0x5db   : > { %1208 = vmatprep.subr.mxu0 %v755_v13 }
 0x5dc   : > { %1209 = vmatpush3.msra.mxu0 %v755_v13 }
 0x5dd   : > { %1210 = vmatprep.subr.mxu0 %v754_v14 }
 0x5de   : > { %1211 = vmatpush3.msra.mxu0 %v754_v14 }
 0x5df   : > { %1212 = vmatprep.subr.mxu0 %v753_v15 }
 0x5e0   : > { %1213 = vmatpush3.msra.mxu0 %v753_v15 }
 0x5e1   : > { %1214 = vmatprep.subr.mxu0 %v752_v16 }
 0x5e2   : > { %1215 = vmatpush3.msra.mxu0 %v752_v16 }
 0x5e3   : > { %1216 = vmatprep.subr.mxu0 %v751_v17 }
 0x5e4   : > { %1217 = vmatpush3.msra.mxu0 %v751_v17 }
 0x5e5   : > { %1218 = vmatprep.subr.mxu0 %v750_v18 }
 0x5e6   : > { %1219 = vmatpush3.msra.mxu0 %v750_v18 }
 0x5e7   : > { %1220 = vmatprep.subr.mxu0 %v749_v19 }
 0x5e8   : > { %1221 = vmatpush3.msra.mxu0 %v749_v19 }
 0x5e9   : > { %1222 = vmatprep.subr.mxu0 %v748_v20 }
 0x5ea   : > { %1223 = vmatpush3.msra.mxu0 %v748_v20 }
 0x5eb   : > { %1225 = vmatmul.mubr.f32.vlgmr.msra.gmra.mxu0 %v480_v5 }
 0x68b   : > { %v563_v22 = vpop.f32.mrf.mxu0 }
 0x68c   : > { %v567_v23 = vadd.f32 %v953_v21, %v563_v22 }
 0x68d   : > { %v1156_v24 = vpop.f32.mrf.mxu0 }
 0x68e   : > { %v954_v25 = vmul.f32 -1.442695, %v567_v23 }
 0x690   : > { %1260 = vpow2.f32 %v954_v25 }
 0x691   : > { %1262 = vtanh.f32 %v567_v23 }
 0x69d   : > { %v1261_v26 = vpop.eup %1260 }
 0x69e   : > { %v571_v27 = vadd.f32 1.0, %v1261_v26  ;;  %v1263_v31 = vpop.eup %1262 }
 0x6a0   : > { %1264 = vrcp.f32 %v571_v27 }
 0x6ab   : > { %v1226_v30 = vpop.f32.mrf.mxu0 }
 0x6ac   : > { %v843_v32 = vadd.f32 %v1226_v30, %v1648_v29 }
 0x6ad   : > { %v1265_v33 = vpop.eup %1264  ;;  %v837_v34 = vpop.f32.mrf.mxu0 }
 0x6ae   : > { %v959_v35 = vmul.f32 -1.442695, %v843_v32  ;;  %v838_v36 = vadd.f32 %v1648_v29, %v837_v34  ;;  %v575_v37 = vsel %vm1533_vm4, %v1263_v31, %v1265_v33 }
 0x6af   : > { %583 = vrot.lane.b32.xlu0 %v575_v37, %s1303_s8  ;;  %v581_v48 = vmul.f32 %v579_v47, %v575_v37 }
 0x6b0   : > { %1266 = vpow2.f32 %v959_v35  ;;  %v958_v38 = vmul.f32 -1.442695, %v838_v36 }
 0x6b2   : > { %1268 = vpow2.f32 %v958_v38 }
 0x6bd   : > { %v1267_v39 = vpop.eup %1266 }
 0x6be   : > { %v869_v41 = vadd.f32 1.0, %v1267_v39 }
 0x6bf   : > { %v1269_v40 = vpop.eup %1268 }
 0x6c0   : > { %v868_v42 = vadd.f32 1.0, %v1269_v40 }
 0x6c2   : > { %1270 = vrcp.f32 %v868_v42 }
 0x6c3   : > { %1272 = vrcp.f32 %v869_v41 }
 0x6cf   : > { %v1271_v43 = vpop.eup %1270 }
 0x6d0   : > { %v1273_v44 = vpop.eup %1272  ;;  %880 = vst [vmem:[%s1347_s24] sm:$0xff] %v1271_v43 }
 0x6d1   : > { %881 = vst [vmem:[%s1347_s24 + $0x8] sm:$0xff] %v1273_v44 }
 0x721   : > { %v584_v45 = vpop.permute.xlu0 %583 }
 0x722   : > { %v586_v46 = vmul.f32 %v584_v45, %v575_v37 }
 0x724   : > { %588 = vrot.lane.b32.xlu0 %v586_v46, %s1304_s9 }
 0x796   : > { %v589_v49 = vpop.permute.xlu0 %588 }
 0x797   : > { %v591_v50 = vadd.f32 %v589_v49, %v581_v48 }
 0x799   : > { %1274 = vtanh.f32 %v591_v50 }
 0x7a6   : > { %v1275_v51 = vpop.eup %1274 }
 0x7a7   : > { %594 = vrot.lane.b32.xlu1 %v1275_v51, %s1303_s8 }
 0x7ab   : > { %599 = vrot.lane.b32.xlu1 %v591_v50, %s1305_s10 }
 0x819   : > { %v595_v52 = vpop.permute.xlu1 %594 }
 0x81a   : > { %v597_v53 = vmul.f32 %v595_v52, %v575_v37 }
 0x81c   : > { %604 = vrot.lane.b32.xlu0 %v597_v53, %s1304_s9 }
 0x81d   : > { %v600_v54 = vpop.permute.xlu1 %599 }
 0x81e   : > { %602 = vst.msk [vmem:[#allocation4] sm:$0xff] %vm336_vm5, %v600_v54 }
 0x825   : > { %v709_v55 = vld [vmem:[#allocation4] sm:$0xff] }
 0x826   : > { %711 = vrot.lane.b32.xlu1 %v709_v55, %s1304_s9 }
 0x88e   : > { %v605_v56 = vpop.permute.xlu0 %604 }
 0x88f   : > { %607 = vst.msk [vmem:[#allocation3] sm:$0xff] %vm336_vm5, %v605_v56 }
 0x896   : > { %v613_v57 = vld [vmem:[#allocation3] sm:$0xff] }
 0x897   : > { %1190 = vmatmul.mubr.f32.vlgmr.msra.gmra.mxu1 %v613_v57  ;;  %1227 = vmatprep.mubr.f32.mxu0 %v613_v57 }
 0x898   : > { %v712_v6 = vpop.permute.xlu1 %711 }
 0x957   : > { %v696_v59 = vpop.f32.mrf.mxu1 }
 0x958   : > { %v700_v60 = vadd.f32 %v955_v58, %v696_v59 }
 0x959   : > { %v1191_v61 = vpop.f32.mrf.mxu1 }
 0x95a   : > { %v956_v62 = vmul.f32 -1.442695, %v700_v60 }
 0x95c   : > { %1276 = vpow2.f32 %v956_v62 }
 0x95d   : > { %1278 = vtanh.f32 %v700_v60 }
 0x969   : > { %v1277_v63 = vpop.eup %1276 }
 0x96a   : > { %v704_v0 = vadd.f32 1.0, %v1277_v63  ;;  %v1279_v1 = vpop.eup %1278 }
 0x96c   : > { %1280 = vrcp.f32 %v704_v0 }
 0x979   : > { %v1281_v2 = vpop.eup %1280 }
 0x97a   : > { %v708_v3 = vsel %vm1533_vm4, %v1279_v1, %v1281_v2 }
 0x97b   : > { %716 = vrot.lane.b32.xlu0 %v708_v3, %s1303_s8  ;;  %v714_v7 = vmul.f32 %v712_v6, %v708_v3 }
 0x9ed   : > { %v717_v4 = vpop.permute.xlu0 %716 }
 0x9ee   : > { %v719_v5 = vmul.f32 %v717_v4, %v708_v3 }
 0x9f0   : > { %721 = vrot.lane.b32.xlu0 %v719_v5, %s1304_s9 }
 0xa62   : > { %v722_v8 = vpop.permute.xlu0 %721 }
 0xa63   : > { %v724_v9 = vadd.f32 %v722_v8, %v714_v7 }
 0xa65   : > { %1282 = vtanh.f32 %v724_v9 }
 0xa72   : > { %v1283_v10 = vpop.eup %1282 }
 0xa73   : > { %727 = vrot.lane.b32.xlu1 %v1283_v10, %s1303_s8 }
 0xa77   : > { %732 = vrot.lane.b32.xlu1 %v724_v9, %s1305_s10 }
 0xae5   : > { %v728_v11 = vpop.permute.xlu1 %727 }
 0xae6   : > { %v730_v12 = vmul.f32 %v728_v11, %v708_v3 }
 0xae8   : > { %737 = vrot.lane.b32.xlu0 %v730_v12, %s1304_s9 }
 0xae9   : > { %v733_v28 = vpop.permute.xlu1 %732 }
 0xaea   : > { %735 = vst.msk [vmem:[#allocation4] sm:$0xff] %vm336_vm5, %v733_v28 }
 0xb5a   : > { %v738_v13 = vpop.permute.xlu0 %737 }
 0xb5b   : > { %740 = vst.msk [vmem:[#allocation3] sm:$0xff] %vm336_vm5, %v738_v13 }
 0xb62   : > { %v741_v14 = vld [vmem:[#allocation3] sm:$0xff] }
 0xb63   : > { %1228 = vmatmul.mubr.f32.gmra.mxu0 %v741_v14 }
 0xc23   : > { %v1229_v15 = vpop.f32.mrf.mxu0 }
 0xc24   : > { %v853_v16 = vadd.f32 %v1229_v15, %v1648_v29 }
 0xc25   : > { %v847_v17 = vpop.f32.mrf.mxu0 }
 0xc26   : > { %v961_v18 = vmul.f32 -1.442695, %v853_v16  ;;  %v848_v19 = vadd.f32 %v1648_v29, %v847_v17 }
 0xc28   : > { %1284 = vpow2.f32 %v961_v18  ;;  %v960_v20 = vmul.f32 -1.442695, %v848_v19 }
 0xc2a   : > { %1286 = vpow2.f32 %v960_v20 }
 0xc35   : > { %v1285_v21 = vpop.eup %1284 }
 0xc36   : > { %v871_v23 = vadd.f32 1.0, %v1285_v21 }
 0xc37   : > { %v1287_v22 = vpop.eup %1286 }
 0xc38   : > { %v870_v24 = vadd.f32 1.0, %v1287_v22 }
 0xc3a   : > { %1288 = vrcp.f32 %v870_v24 }
 0xc3b   : > { %1290 = vrcp.f32 %v871_v23 }
 0xc47   : > { %v1289_v25 = vpop.eup %1288 }
 0xc48   : > { %v1291_v26 = vpop.eup %1290  ;;  %882 = vst [vmem:[%s1347_s24 + $0x10] sm:$0xff] %v1289_v25 }
 0xc49   : > { %883 = vst [vmem:[%s1347_s24 + $0x18] sm:$0xff] %v1291_v26 }
 0xc4a PF: > { %s14_s15 = sadd.s32 1, %s1298_s15  }
 0xc4b   : > { %p11_p5 = scmp.ge.s32.totalorder %s14_s15, 4  }
 0xc4d   :  { %13 = sbr.rel (!%p11_p5) target bundleno = 1 (0x1), region = 76 }

</bundles_post_ra>
